<compile_context>
chip_gen: v7x
topology: tpu7x:2x2x1
jax: 0.10.0
libtpu: 0.0.40
codegen_flags: <defaults>
</compile_context>

<pallas_src>
import jax
import jax.numpy as jnp
from jax.experimental import pallas as pl
from jax.experimental.pallas import tpu as pltpu


def _round_up(x, m):
    return ((x + m - 1) // m) * m


def autorec_kernel(x_ref, w1_ref, b1_ref, w2_ref, b2_ref, o_ref, h_ref):
    # Compute the hidden layer once per batch tile (first output-feature step),
    # stage it in VMEM scratch, and reuse it for every output-feature tile j.
    @pl.when(pl.program_id(1) == 0)
    def _():
        h_ref[...] = (
            jnp.dot(x_ref[...], w1_ref[...], preferred_element_type=jnp.float32)
            + b1_ref[...]
        )

    # Second matmul: bf16 x bf16 -> f32 accumulation on the MXU, bias in f32.
    out = (
        jnp.dot(h_ref[...].astype(w2_ref.dtype), w2_ref[...],
                preferred_element_type=jnp.float32)
        + b2_ref[...]
    )
    o_ref[...] = out.astype(o_ref.dtype)


def autorec_forward(x, w1_t, b1, w2_t, b2, *, tm=256, tn=256):
    """AutoRec forward.

    x: (B, I) float32; w1_t: (I, H); b1: (H,); w2_t: (H, I); b2: (I,).
    Returns (B, I) in x.dtype. Matmuls run in bf16 with f32 accumulation.
    """
    B, I = x.shape
    H = w1_t.shape[1]
    out_dtype = x.dtype

    # --- batch tiling (pad B up to a multiple of the batch tile) ---
    tm = min(tm, _round_up(B, 8))
    b_pad = _round_up(B, tm)
    if b_pad != B:
        x = jnp.pad(x, ((0, b_pad - B), (0, 0)))

    # --- output-feature tiling (lane-aligned, must divide I) ---
    if I % tn != 0:
        tn = 128 if I % 128 == 0 else I
    grid = (b_pad // tm, I // tn)

    # bf16 operands for the MXU; biases stay f32 for exact-ish bias add.
    x_bf = x.astype(jnp.bfloat16)
    w1_bf = w1_t.astype(jnp.bfloat16)
    w2_bf = w2_t.astype(jnp.bfloat16)
    b1_r = b1.reshape(1, H).astype(jnp.float32)
    b2_r = b2.reshape(1, I).astype(jnp.float32)

    # Scoped-VMEM budget for the per-step working set (operands double-buffered).
    vmem_need = (
        2 * tm * I * 2        # x tile (bf16)
        + 2 * I * H * 2       # w1 (bf16, VMEM-resident)
        + 2 * H * 4           # b1 (f32)
        + 2 * H * tn * 2      # w2 output tile (bf16)
        + 2 * tn * 4          # b2 output tile (f32)
        + 2 * tm * tn * 4     # out tile (f32)
        + tm * H * 4          # hidden scratch (f32)
    )
    vmem_limit = min(max(int(vmem_need * 1.5) + (4 << 20), 32 << 20), 120 << 20)

    out = pl.pallas_call(
        autorec_kernel,
        out_shape=jax.ShapeDtypeStruct((b_pad, I), out_dtype),
        grid_spec=pltpu.PrefetchScalarGridSpec(
            num_scalar_prefetch=0,
            grid=grid,
            in_specs=[
                pl.BlockSpec((tm, I), lambda i, j: (i, 0)),   # x: constant over j
                pl.BlockSpec((I, H), lambda i, j: (0, 0)),    # w1: resident
                pl.BlockSpec((1, H), lambda i, j: (0, 0)),    # b1: resident
                pl.BlockSpec((H, tn), lambda i, j: (0, j)),   # w2: output tile
                pl.BlockSpec((1, tn), lambda i, j: (0, j)),   # b2: output tile
            ],
            out_specs=pl.BlockSpec((tm, tn), lambda i, j: (i, j)),
            scratch_shapes=[pltpu.VMEM((tm, H), jnp.float32)],
        ),
        compiler_params=pltpu.CompilerParams(
            dimension_semantics=("parallel", "arbitrary"),
            vmem_limit_bytes=vmem_limit,
        ),
    )(x_bf, w1_bf, b1_r, w2_bf, b2_r)

    return out[:B] if b_pad != B else out


def init_linear_params(key, in_features, out_features, dtype=jnp.float32):
    """Matches PyTorch nn.Linear default init:
    W, b ~ U(-1/sqrt(in_features), 1/sqrt(in_features))."""
    k_w, k_b = jax.random.split(key)
    bound = 1.0 / jnp.sqrt(jnp.array(in_features, dtype=dtype))
    w = jax.random.uniform(k_w, (out_features, in_features), dtype,
                           minval=-bound, maxval=bound)
    b = jax.random.uniform(k_b, (out_features,), dtype,
                           minval=-bound, maxval=bound)
    return w, b


if __name__ == "__main__":
    def run_case(key, batch, input_size, hidden_size):
        k_x, k1, k2 = jax.random.split(key, 3)
        x = jax.random.normal(k_x, (batch, input_size), jnp.float32)
        w1, b1 = init_linear_params(k1, input_size, hidden_size)  # input_layer
        w2, b2 = init_linear_params(k2, hidden_size, input_size)  # output_layer

        out = autorec_forward(x, w1.T, b1, w2.T, b2)
        jax.block_until_ready(out)

        # Pure-JAX f32 reference of the PyTorch forward; bf16 MXU path needs a
        # looser tolerance than the old all-f32 kernel.
        ref = (x @ w1.T + b1) @ w2.T + b2
        assert out.shape == ref.shape
        max_err = float(jnp.max(jnp.abs(out - ref)))
        assert jnp.allclose(out, ref, atol=3e-2, rtol=3e-2), max_err
        return out

    key = jax.random.PRNGKey(0)
    k_a, k_b = jax.random.split(key)
    # Small, lane-aligned shapes consistent with the module.
    run_case(k_a, batch=8, input_size=256, hidden_size=128)
    # Exercises batch padding (12 -> 16) and multi-tile output features (384/128).
    run_case(k_b, batch=12, input_size=384, hidden_size=128)

    print("KERNEL_OK")
</pallas_src>

<mosaic_0001>
module attributes {stable_mosaic.version = 11 : i64} {
  func.func @autorec_kernel(%arg0: i32, %arg1: i32, %arg2: memref<8x256xbf16, #tpu.memory_space<vmem>>, %arg3: memref<256x128xbf16, #tpu.memory_space<vmem>>, %arg4: memref<1x128xf32, #tpu.memory_space<vmem>>, %arg5: memref<128x256xbf16, #tpu.memory_space<vmem>>, %arg6: memref<1x256xf32, #tpu.memory_space<vmem>>, %arg7: memref<8x256xf32, #tpu.memory_space<vmem>>, %arg8: memref<8x128xf32, #tpu.memory_space<vmem>>) attributes {dimension_semantics = [#tpu.dimension_semantics<parallel>, #tpu.dimension_semantics<arbitrary>], iteration_bounds = array<i64: 1, 1>, scalar_prefetch = 0 : i64, scratch_operands = 1 : i64, tpu.core_type = #tpu.core_type<tc>, window_params = [{transform_indices = @transform_0, window_bounds = array<i64: 8, 256>}, {pipeline_mode = #tpu.pipeline_mode<synchronous>, transform_indices = @transform_1, window_bounds = array<i64: 256, 128>}, {pipeline_mode = #tpu.pipeline_mode<synchronous>, transform_indices = @transform_2, window_bounds = array<i64: 1, 128>}, {transform_indices = @transform_3, window_bounds = array<i64: 128, 256>}, {transform_indices = @transform_4, window_bounds = array<i64: 1, 256>}, {transform_indices = @transform_5, window_bounds = array<i64: 8, 256>}]} {
    %c0_i32 = arith.constant 0 : i32
    %0 = arith.cmpi eq, %arg1, %c0_i32 : i32
    %1 = arith.extui %0 : i1 to i32
    %c0_i32_0 = arith.constant 0 : i32
    %2 = arith.cmpi ne, %1, %c0_i32_0 : i32
    scf.if %2 {
      %c0_8 = arith.constant 0 : index
      %c0_9 = arith.constant 0 : index
      %11 = vector.load %arg2[%c0_8, %c0_9] : memref<8x256xbf16, #tpu.memory_space<vmem>>, vector<8x256xbf16>
      %c0_10 = arith.constant 0 : index
      %c0_11 = arith.constant 0 : index
      %12 = vector.load %arg3[%c0_10, %c0_11] : memref<256x128xbf16, #tpu.memory_space<vmem>>, vector<256x128xbf16>
      %cst_12 = arith.constant dense<0.000000e+00> : vector<8x128xf32>
      %13 = tpu.matmul %11, %12, %cst_12 {dimension_numbers = #tpu.dot_dimension_numbers<[1], [0], [0], [1], [0, 0, 1, 1], [], []>} : vector<8x256xbf16>, vector<256x128xbf16>, vector<8x128xf32> -> vector<8x128xf32>
      %c0_13 = arith.constant 0 : index
      %c0_14 = arith.constant 0 : index
      %14 = vector.load %arg4[%c0_13, %c0_14] : memref<1x128xf32, #tpu.memory_space<vmem>>, vector<1x128xf32>
      %15 = vector.broadcast %14 : vector<1x128xf32> to vector<8x128xf32>
      %16 = arith.addf %13, %15 : vector<8x128xf32>
      %c0_15 = arith.constant 0 : index
      %c0_16 = arith.constant 0 : index
      %17 = vector.load %arg8[%c0_15, %c0_16] : memref<8x128xf32, #tpu.memory_space<vmem>>, vector<8x128xf32>
      tpu.vector_store %arg8[%c0_15, %c0_16], %16 {strides = array<i32>} : memref<8x128xf32, #tpu.memory_space<vmem>>, vector<8x128xf32>,
    } else {
    }
    %c0 = arith.constant 0 : index
    %c0_1 = arith.constant 0 : index
    %3 = vector.load %arg8[%c0, %c0_1] : memref<8x128xf32, #tpu.memory_space<vmem>>, vector<8x128xf32>
    %4 = arith.truncf %3 : vector<8x128xf32> to vector<8x128xbf16>
    %c0_2 = arith.constant 0 : index
    %c0_3 = arith.constant 0 : index
    %5 = vector.load %arg5[%c0_2, %c0_3] : memref<128x256xbf16, #tpu.memory_space<vmem>>, vector<128x256xbf16>
    %cst = arith.constant dense<0.000000e+00> : vector<8x256xf32>
    %6 = tpu.matmul %4, %5, %cst {dimension_numbers = #tpu.dot_dimension_numbers<[1], [0], [0], [1], [0, 0, 1, 1], [], []>} : vector<8x128xbf16>, vector<128x256xbf16>, vector<8x256xf32> -> vector<8x256xf32>
    %c0_4 = arith.constant 0 : index
    %c0_5 = arith.constant 0 : index
    %7 = vector.load %arg6[%c0_4, %c0_5] : memref<1x256xf32, #tpu.memory_space<vmem>>, vector<1x256xf32>
    %8 = vector.broadcast %7 : vector<1x256xf32> to vector<8x256xf32>
    %9 = arith.addf %6, %8 : vector<8x256xf32>
    %c0_6 = arith.constant 0 : index
    %c0_7 = arith.constant 0 : index
    %10 = vector.load %arg7[%c0_6, %c0_7] : memref<8x256xf32, #tpu.memory_space<vmem>>, vector<8x256xf32>
    tpu.vector_store %arg7[%c0_6, %c0_7], %9 {strides = array<i32>} : memref<8x256xf32, #tpu.memory_space<vmem>>, vector<8x256xf32>,
    return
  }
  func.func @transform_0(%arg0: i32, %arg1: i32) -> (i32, i32) {
    %c0_i32 = arith.constant 0 : i32
    %c0_i32_0 = arith.constant 0 : i32
    return %arg0, %c0_i32 : i32, i32
  }
  func.func @transform_1(%arg0: i32, %arg1: i32) -> (i32, i32) {
    %c0_i32 = arith.constant 0 : i32
    %c0_i32_0 = arith.constant 0 : i32
    %c0_i32_1 = arith.constant 0 : i32
    return %c0_i32, %c0_i32_0 : i32, i32
  }
  func.func @transform_2(%arg0: i32, %arg1: i32) -> (i32, i32) {
    %c0_i32 = arith.constant 0 : i32
    %c0_i32_0 = arith.constant 0 : i32
    %c0_i32_1 = arith.constant 0 : i32
    return %c0_i32, %c0_i32_0 : i32, i32
  }
  func.func @transform_3(%arg0: i32, %arg1: i32) -> (i32, i32) {
    %c0_i32 = arith.constant 0 : i32
    %c0_i32_0 = arith.constant 0 : i32
    return %c0_i32, %arg1 : i32, i32
  }
  func.func @transform_4(%arg0: i32, %arg1: i32) -> (i32, i32) {
    %c0_i32 = arith.constant 0 : i32
    %c0_i32_0 = arith.constant 0 : i32
    return %c0_i32, %arg1 : i32, i32
  }
  func.func @transform_5(%arg0: i32, %arg1: i32) -> (i32, i32) {
    %c0_i32 = arith.constant 0 : i32
    return %arg0, %arg1 : i32, i32
  }
}

</mosaic_0001>

<bundles_post_ra>
// kernel: tpu_custom_call.1
= control target key start
LH: loop header
LB: loop body
LE: loop exit
PB: predicated region body
PF: predicated region fallthrough
CT: control target
= control target key end

     0   :  { %10 = vsyncpa [#allocation4], 0  ;;  %s713_s0 = inlined_call_operand.hbm [shape: bf16[8,256], index: 0, kind: input, shape index: {}]   ;;  %s714_s1 = inlined_call_operand.hbm [shape: bf16[256,128], index: 1, kind: input, shape index: {}]   ;;  %s715_s2 = inlined_call_operand.vmem [shape: f32[1,128], index: 2, kind: input, shape index: {}]   ;;  %s716_s3 = inlined_call_operand.hbm [shape: bf16[128,256], index: 3, kind: input, shape index: {}]   ;;  %s717_s4 = inlined_call_operand.vmem [shape: f32[1,256], index: 4, kind: input, shape index: {}]   ;;  %s718_s5 = inlined_call_operand.hbm [shape: f32[8,256], index: 5, kind: output, shape index: {}]  }
   0x1   :  { %11 = vsyncpa [#allocation7], 0 }
   0x2   :  { %12 = vsyncpa [#allocation5], 0  ;;  %s620_s18 = smov [#allocation6]   ;;  %s526_s22 = scalar_lea.hbm %s714_s1, 2048 }
   0x3   :  { %s28_s19 = sshll.u32 %s620_s18, 4  ;;  %p527_p0 = scmp.ne.s32.totalorder %s714_s1, %s526_s22  ;;  %s29_s19 = int_to_ptr.vmem [resolvable:$true] %s28_s19 }
   0x4   :  { %p530_p1 = scmp.lt.u32.totalorder %s526_s22, %s714_s1 }
   0x6   :  { %p532_p2 = pnand %p530_p1, %p527_p0 }
   0x8   :  { %535 = shalt.err (!%p532_p2)
}
   0x9   :  { %s536_s27 = scalar_lea.vmem %s29_s19, 2048  ;;  %p541_p4 = scmp.lt.s32.totalorder %s29_s19, %s29_s19 }
   0xa   :  { %p537_p3 = scmp.ne.s32.totalorder %s29_s19, %s536_s27  ;;  %p542_p5 = scmp.lt.s32.totalorder %s536_s27, %s536_s27 }
   0xc   :  { %p543_p6 = por %p542_p5, %p541_p4 }
   0xe   :  { %p544_p7 = pnand %p543_p6, %p537_p3 }
  0x10   :  { %547 = shalt.err (!%p544_p7)
}
  0x11   :  { %s621_s28 = smov 64   ;;  %s622_s29 = smov 4  }
  0x12   :  { %34 = dma.hbm_to_vmem [thread:$0]  %s714_s1, 2048, %s29_s19, [#allocation7], %s621_s28, %s621_s28, %s622_s29  }
  0x13   :  { %s623_s7 = smov [#allocation3]   ;;  %s624_s9 = smov [#allocation8]  }
  0x14   :  { %s19_s8 = sshll.u32 %s623_s7, 4  ;;  %s42_s10 = sshll.u32 %s624_s9, 4  ;;  %s20_s8 = int_to_ptr.vmem [resolvable:$true] %s19_s8  ;;  %s43_s10 = int_to_ptr.vmem [resolvable:$true] %s42_s10 }
  0x15   :  { %s548_s13 = scalar_lea.hbm %s713_s0, 128 }
  0x16   :  { %p549_p8 = scmp.ne.s32.totalorder %s713_s0, %s548_s13  ;;  %p552_p9 = scmp.lt.u32.totalorder %s548_s13, %s713_s0 }
  0x18   :  { %p554_p10 = pnand %p552_p9, %p549_p8 }
  0x1a   :  { %557 = shalt.err (!%p554_p10)
}
  0x1b   :  { %s558_s1 = scalar_lea.vmem %s20_s8, 128  ;;  %p563_p12 = scmp.lt.s32.totalorder %s20_s8, %s20_s8 }
  0x1c   :  { %p559_p11 = scmp.ne.s32.totalorder %s20_s8, %s558_s1  ;;  %p564_p13 = scmp.lt.s32.totalorder %s558_s1, %s558_s1 }
  0x1e   :  { %p565_p0 = por %p564_p13, %p563_p12 }
  0x20   :  { %p566_p1 = pnand %p565_p0, %p559_p11 }
  0x22   :  { %569 = shalt.err (!%p566_p1)
}
  0x23   :  { %22 = dma.hbm_to_vmem [thread:$0]  %s713_s0, 128, %s20_s8, [#allocation4]  }
  0x24   :  { %s570_s22 = scalar_lea.hbm %s716_s3, 2048 }
  0x25   :  { %p571_p2 = scmp.ne.s32.totalorder %s716_s3, %s570_s22  ;;  %p574_p3 = scmp.lt.u32.totalorder %s570_s22, %s716_s3 }
  0x27   :  { %p576_p4 = pnand %p574_p3, %p571_p2 }
  0x29   :  { %579 = shalt.err (!%p576_p4)
}
  0x2a   :  { %s580_s27 = scalar_lea.vmem %s43_s10, 2048  ;;  %p585_p6 = scmp.lt.s32.totalorder %s43_s10, %s43_s10 }
  0x2b   :  { %p581_p5 = scmp.ne.s32.totalorder %s43_s10, %s580_s27  ;;  %p586_p7 = scmp.lt.s32.totalorder %s580_s27, %s580_s27 }
  0x2d   :  { %p587_p8 = por %p586_p7, %p585_p6 }
  0x2f   :  { %p588_p9 = pnand %p587_p8, %p581_p5 }
  0x31   :  { %591 = shalt.err (!%p588_p9)
}
  0x32   :  { %s625_s0 = smov 128   ;;  %s626_s28 = smov 8  }
  0x33   :  { %48 = dma.hbm_to_vmem [thread:$0]  %s716_s3, 2048, %s43_s10, [#allocation7], %s625_s0, %s625_s0, %s626_s28  }
  0x34   :  { %614 = dma.done.wait [#allocation4], 128  }
  0x35   :  { %615 = vsyncadd [#allocation4], 4294967168 }
  0x36   :  { %616 = dma.done.wait [#allocation7], 4096  }
  0x37   :  { %617 = vsyncadd [#allocation7], 4294963200  ;;  %v484_v0 = vld [vmem:[#allocation6 + $0x40] sm:$0xff]   ;;  %v486_v2 = vld [vmem:[#allocation6 + $0x48] sm:$0xff]   ;;  %v627_v35 = vmov 0   ;;  %v269_v44 = vlaneseq  ;;  %s628_s9 = smov [#allocation9]  }
  0x38   :  { %v485_v1 = vld [vmem:[#allocation6] sm:$0xff]   ;;  %453 = vmatprep.subr.bf16.mxu0 %v484_v0  ;;  %v487_v3 = vld [vmem:[#allocation6 + $0x8] sm:$0xff]   ;;  %v488_v4 = vld [vmem:[#allocation6 + $0x50] sm:$0xff]   ;;  %391 = vmatprep.mubr.bf16.mxu1 %v627_v35  ;;  %s408_s10 = sshll.u32 %s628_s9, 4  ;;  %s409_s10 = int_to_ptr.vmem [resolvable:$true] %s408_s10 }
  0x39   :  { %454 = vmatpush3.bf16.msra.mxu0 %v485_v1  ;;  %v489_v5 = vld [vmem:[#allocation6 + $0x10] sm:$0xff]   ;;  %v490_v6 = vld [vmem:[#allocation6 + $0x58] sm:$0xff]   ;;  %v492_v8 = vld [vmem:[#allocation6 + $0x60] sm:$0xff]   ;;  %v270_v45 = vshrl.u32 %v269_v44, 7  ;;  %p597_p11 = scmp.lt.s32.totalorder %s409_s10, %s409_s10 }
  0x3a   :  { %455 = vmatprep.subr.bf16.mxu0 %v486_v2  ;;  %v491_v7 = vld [vmem:[#allocation6 + $0x18] sm:$0xff]   ;;  %v493_v9 = vld [vmem:[#allocation6 + $0x20] sm:$0xff]   ;;  %v494_v10 = vld [vmem:[#allocation6 + $0x68] sm:$0xff]  }
  0x3b   :  { %v65_v11 = vld [vmem:[#allocation3] sm:$0xff]  ;;  %v502_v13 = vld [vmem:[#allocation8 + $0x4] ss:$8 sps:$4 sm:$0xff]   ;;  %v504_v14 = vld [vmem:[#allocation8] ss:$8 sps:$4 sm:$0xff]   ;;  %v271_v46 = vsub.s32 0, %v270_v45 }
  0x3c   :  { %v420_v12 = vcombine.high %v65_v11, %v65_v11  ;;  %v505_v15 = vld [vmem:[#allocation8 + $0x14] ss:$8 sps:$4 sm:$0xff]   ;;  %v495_v16 = vld [vmem:[#allocation6 + $0x28] sm:$0xff]   ;;  %359 = vmatprep.subr.bf16.mxu1 %v502_v13  ;;  %v507_v18 = vld [vmem:[#allocation8 + $0x10] ss:$8 sps:$4 sm:$0xff]   ;;  %v419_v26 = vcombine.low %v65_v11, %v65_v11  ;;  %v275_v48 = vsub.s32 1, %v270_v45 }
  0x3d   :  { %456 = vmatpush3.bf16.msra.mxu0 %v487_v3  ;;  %v496_v17 = vld [vmem:[#allocation6 + $0x70] sm:$0xff]   ;;  %360 = vmatpush1.bf16.msra.mxu1 %v504_v14  ;;  %v508_v19 = vld [vmem:[#allocation8 + $0x24] ss:$8 sps:$4 sm:$0xff]   ;;  %v498_v21 = vld [vmem:[#allocation6 + $0x78] sm:$0xff]  }
  0x3e   :  { %457 = vmatprep.subr.bf16.mxu0 %v488_v4  ;;  %240 = vmatprep.mubr.bf16.mxu0 %v420_v12  ;;  %v497_v20 = vld [vmem:[#allocation6 + $0x30] sm:$0xff]   ;;  %v510_v22 = vld [vmem:[#allocation8 + $0x20] ss:$8 sps:$4 sm:$0xff]   ;;  %v499_v24 = vld [vmem:[#allocation6 + $0x38] sm:$0xff]  }
  0x3f   :  { %361 = vmatprep.subr.bf16.mxu1 %v505_v15  ;;  %v511_v23 = vld [vmem:[#allocation8 + $0x34] ss:$8 sps:$4 sm:$0xff]   ;;  %v513_v25 = vld [vmem:[#allocation8 + $0x30] ss:$8 sps:$4 sm:$0xff]   ;;  %v514_v27 = vld [vmem:[#allocation8 + $0x44] ss:$8 sps:$4 sm:$0xff]  }
  0x40   :  { %v516_v28 = vld [vmem:[#allocation8 + $0x40] ss:$8 sps:$4 sm:$0xff]   ;;  %v517_v29 = vld [vmem:[#allocation8 + $0x54] ss:$8 sps:$4 sm:$0xff]   ;;  %v519_v30 = vld [vmem:[#allocation8 + $0x50] ss:$8 sps:$4 sm:$0xff]  }
  0x41   :  { %458 = vmatpush3.bf16.msra.mxu0 %v489_v5  ;;  %362 = vmatpush1.bf16.msra.mxu1 %v507_v18  ;;  %v520_v31 = vld [vmem:[#allocation8 + $0x64] ss:$8 sps:$4 sm:$0xff]   ;;  %v522_v32 = vld [vmem:[#allocation8 + $0x60] ss:$8 sps:$4 sm:$0xff]   ;;  %v523_v33 = vld [vmem:[#allocation8 + $0x74] ss:$8 sps:$4 sm:$0xff]  }
  0x42   :  { %459 = vmatprep.subr.bf16.mxu0 %v490_v6  ;;  %363 = vmatprep.subr.bf16.mxu1 %v508_v19  ;;  %v525_v34 = vld [vmem:[#allocation8 + $0x70] ss:$8 sps:$4 sm:$0xff]  }
  0x43   :  { %v418_v37 = vld [vmem:[%s715_s2] ss:$0 sm:$0xff]  ;;  %s592_s2 = scalar_lea.vmem %s409_s10, 256 }
  0x44   :  { %v267_v47 = vld [vmem:[%s717_s4] sm:$0x3]  ;;  %p593_p10 = scmp.ne.s32.totalorder %s409_s10, %s592_s2  ;;  %p598_p12 = scmp.lt.s32.totalorder %s592_s2, %s592_s2 }
  0x45   :  { %460 = vmatpush3.bf16.msra.mxu0 %v491_v7  ;;  %364 = vmatpush1.bf16.msra.mxu1 %v510_v22  ;;  %v272_v49 = vrot.slane %v267_v47, %v271_v46  ;;  %v276_v50 = vrot.slane %v267_v47, %v275_v48 }
  0x46   :  { %461 = vmatprep.subr.bf16.mxu0 %v492_v8  ;;  %365 = vmatprep.subr.bf16.mxu1 %v511_v23  ;;  %p599_p13 = por %p598_p12, %p597_p11 }
  0x48   :  { %p600_p0 = pnand %p599_p13, %p593_p10 }
  0x49   :  { %462 = vmatpush3.bf16.msra.mxu0 %v493_v9  ;;  %366 = vmatpush1.bf16.msra.mxu1 %v513_v25 }
  0x4a   :  { %463 = vmatprep.subr.bf16.mxu0 %v494_v10  ;;  %367 = vmatprep.subr.bf16.mxu1 %v514_v27 }
  0x4d   :  { %464 = vmatpush3.bf16.msra.mxu0 %v495_v16  ;;  %368 = vmatpush1.bf16.msra.mxu1 %v516_v28 }
  0x4e   :  { %465 = vmatprep.subr.bf16.mxu0 %v496_v17  ;;  %369 = vmatprep.subr.bf16.mxu1 %v517_v29 }
  0x51   :  { %466 = vmatpush3.bf16.msra.mxu0 %v497_v20  ;;  %370 = vmatpush1.bf16.msra.mxu1 %v519_v30 }
  0x52   :  { %467 = vmatprep.subr.bf16.mxu0 %v498_v21  ;;  %371 = vmatprep.subr.bf16.mxu1 %v520_v31 }
  0x55   :  { %468 = vmatpush3.bf16.msra.mxu0 %v499_v24  ;;  %372 = vmatpush1.bf16.msra.mxu1 %v522_v32 }
  0x56   :  { %373 = vmatprep.subr.bf16.mxu1 %v523_v33 }
  0x58   :  { %241 = vmatmul.mubr.bf16.vlgmr.msra.gmra.mrb[0].mxu0 %v419_v26 }
  0x59   :  { %374 = vmatpush1.bf16.msra.mxu1 %v525_v34 }
 0x12b   :  { %v469_v36 = vpop.f32.mrb[0].mxu0 }
 0x12c   :  { %v470_v38 = vpop.f32.mrb[1].mxu0 }
 0x12d   :  { %v471_v39 = vadd.f32 %v470_v38, %v469_v36  ;;  %v472_v40 = vpop.f32.mrb[2].mxu0 }
 0x12e   :  { %v473_v41 = vpop.f32.mrb[3].mxu0 }
 0x12f   :  { %v243_v42 = vadd.f32 %v471_v39, %v418_v37 }
 0x131   :  { %v250_v43 = vpack.c.bf16 %v243_v42, %v243_v42 }
 0x133   :  { %392 = vmatmul.mubr.bf16.vlgmr.msra.gmra.mrb[0].mxu1 %v250_v43 }
 0x206   :  { %v393_v51 = vpop.f32.mrb[0].mxu1 }
 0x207   :  { %v394_v52 = vadd.f32 %v393_v51, %v272_v49  ;;  %v395_v53 = vpop.f32.mrb[1].mxu1 }
 0x208   :  { %v396_v54 = vadd.f32 %v395_v53, %v276_v50  ;;  %v397_v55 = vpop.f32.mrb[2].mxu1 }
 0x209   :  { %400 = vst [vmem:[#allocation9] sm:$0xff] %v394_v52  ;;  %v398_v56 = vpop.f32.mrb[3].mxu1 }
 0x20a   :  { %401 = vst [vmem:[#allocation9 + $0x8] sm:$0xff] %v396_v54 }
 0x20b   :  { %603 = shalt.err (!%p600_p0)
}
 0x20c   :  { %s604_s12 = scalar_lea.hbm %s718_s5, 256 }
 0x20d   :  { %p605_p1 = scmp.ne.s32.totalorder %s718_s5, %s604_s12  ;;  %p608_p2 = scmp.lt.u32.totalorder %s604_s12, %s718_s5 }
 0x20f   :  { %p610_p3 = pnand %p608_p2, %p605_p1 }
 0x211   :  { %613 = shalt.err (!%p610_p3)
}
 0x212   :  { %411 = dma.vmem_to_hbm [thread:$0]  %s409_s10, 256, %s718_s5, [#allocation5]  }
 0x213   :  { %618 = dma.done.wait [#allocation5], 256  }
 0x214   :  { %619 = vsyncadd [#allocation5], 4294967040 }
 0x215   :  { %415 = vsyncpa [#allocation4], 1 }
 0x216   :  { %416 = vsyncpa [#allocation7], 1 }
 0x217   :  { %417 = vsyncpa [#allocation5], 1 }

</bundles_post_ra>
